<compile_context>
chip_gen: v7x
topology: tpu7x:2x2x1
jax: 0.10.0
libtpu: 0.0.40
codegen_flags: <defaults>
</compile_context>

<pallas_src>
import math

import jax
import jax.numpy as jnp
from jax.experimental import pallas as pl
from jax.experimental.pallas import tpu as pltpu

_LANES = 128
_MAX_TILE_ROWS = 4096               # 4096 * 128 * 4B = 2 MiB per f32 buffer
_VMEM_LIMIT_BYTES = 32 * 1024 * 1024


def _round_up(n, m):
    return ((n + m - 1) // m) * m


def _sublanes_for(dtype):
    # Native sublane tile: f32 -> 8, bf16/f16 -> 16, int8/fp8 -> 32.
    itemsize = jnp.dtype(dtype).itemsize
    return max(8, 32 // max(itemsize, 1))


def _num_tensorcores():
    # v7x chips have 2 TensorCores; v5e/v6e have 1.  Conservative fallback: 1.
    try:
        kind = jax.local_devices()[0].device_kind.lower()
    except Exception:
        return 1
    return 2 if "v7" in kind else 1


def _pick_tile_rows(rows, sublanes, two_cores, max_tile_rows):
    max_tile_rows = max(sublanes, _round_up(max_tile_rows, sublanes))
    if two_cores and rows > sublanes:
        # >= 2 grid steps so both TensorCores pull from HBM (megacore).
        return min(max_tile_rows, _round_up(pl.cdiv(rows, 2), sublanes))
    if rows <= max_tile_rows:
        return rows                 # single full-extent block, grid = 1
    return max_tile_rows


def _poly3_kernel(coef_ref, x_ref, o_ref):
    # coef_ref: SMEM (4,) float32 -> scalars a, b, c, d
    a = coef_ref[0]
    b = coef_ref[1]
    c = coef_ref[2]
    d = coef_ref[3]
    x = x_ref[...].astype(jnp.float32)          # (tile_rows, lanes) in VMEM
    y = ((d * x + c) * x + b) * x + a           # Horner form: 6 VALU ops
    o_ref[...] = y.astype(o_ref.dtype)


def _poly3_blocks(x2d, coefs, tile_rows, out_dtype):
    rows, cols = x2d.shape
    grid = (pl.cdiv(rows, tile_rows),)
    elem_bytes = jnp.dtype(out_dtype).itemsize
    cost = pl.CostEstimate(
        flops=6 * rows * cols,
        transcendentals=0,
        bytes_accessed=2 * rows * cols * elem_bytes,
    )
    return pl.pallas_call(
        _poly3_kernel,
        out_shape=jax.ShapeDtypeStruct((rows, cols), out_dtype),
        grid_spec=pltpu.PrefetchScalarGridSpec(
            num_scalar_prefetch=0,
            grid=grid,
            in_specs=[
                pl.BlockSpec(memory_space=pltpu.MemorySpace.SMEM),
                pl.BlockSpec((tile_rows, cols), lambda i: (i, 0)),
            ],
            out_specs=pl.BlockSpec((tile_rows, cols), lambda i: (i, 0)),
        ),
        compiler_params=pltpu.CompilerParams(
            dimension_semantics=("parallel",),
            vmem_limit_bytes=_VMEM_LIMIT_BYTES,
        ),
        cost_estimate=cost,
    )(coefs, x2d)


def polynomial3_forward(x, a, b, c, d, *, max_tile_rows=_MAX_TILE_ROWS):
    """Elementwise cubic polynomial, matching Polynomial3.forward.

    x: float array of any shape (the PyTorch reference uses a 1-D tensor).
    a, b, c, d: scalar parameters.
    Returns an array with the same shape/dtype as x.
    """
    orig_shape = x.shape
    orig_dtype = x.dtype
    if not jnp.issubdtype(orig_dtype, jnp.floating):
        raise TypeError(f"polynomial3_forward expects a float input, got {orig_dtype}")

    coefs = jnp.stack(
        [jnp.asarray(a, jnp.float32), jnp.asarray(b, jnp.float32),
         jnp.asarray(c, jnp.float32), jnp.asarray(d, jnp.float32)]
    )

    xf = x.reshape(-1)
    n = xf.shape[0]
    if n == 0:
        return x

    # Tiny inputs (< 128 elements): single full-extent (1, n) block.
    if n < _LANES:
        return _poly3_blocks(xf.reshape(1, n), coefs, 1, orig_dtype).reshape(orig_shape)

    n_main = (n // _LANES) * _LANES
    n_tail = n - n_main
    rows = n_main // _LANES

    sublanes = _sublanes_for(orig_dtype)
    two_cores = _num_tensorcores() >= 2
    tile_rows = _pick_tile_rows(rows, sublanes, two_cores, max_tile_rows)

    x2d = xf[:n_main].reshape(rows, _LANES)     # zero-copy when n_tail == 0
    out2d = _poly3_blocks(x2d, coefs, tile_rows, orig_dtype)

    if n_tail == 0:
        return out2d.reshape(orig_shape)

    # < 128-element tail handled with plain jnp (same f32 Horner numerics).
    xt = xf[n_main:].astype(jnp.float32)
    a32, b32, c32, d32 = coefs[0], coefs[1], coefs[2], coefs[3]
    yt = (((d32 * xt + c32) * xt + b32) * xt + a32).astype(orig_dtype)
    return jnp.concatenate([out2d.reshape(-1), yt]).reshape(orig_shape)


def _reference(x, a, b, c, d):
    return a + b * x + c * x ** 2 + d * x ** 3


if __name__ == "__main__":
    key = jax.random.PRNGKey(0)
    # Deterministic stand-ins for the torch.randn(()) parameters.
    a, b, c, d = [v for v in jax.random.normal(key, (4,), dtype=jnp.float32)]

    poly = jax.jit(polynomial3_forward, static_argnames=("max_tile_rows",))

    # 1) Same input as the reference script: linspace(-pi, pi, 2000)
    #    -> 1920-element aligned prefix through the kernel + 80-element tail.
    x = jnp.linspace(-math.pi, math.pi, 2000, dtype=jnp.float32)
    y = jax.block_until_ready(poly(x, a, b, c, d))
    assert y.shape == x.shape and y.dtype == x.dtype
    assert jnp.allclose(y, _reference(x, a, b, c, d), rtol=1e-5, atol=1e-5)

    # 2) Fully lane-aligned input (zero-copy path, single full-extent block).
    x_al = jnp.linspace(-2.0, 2.0, 1024, dtype=jnp.float32)
    y_al = jax.block_until_ready(poly(x_al, a, b, c, d))
    assert jnp.allclose(y_al, _reference(x_al, a, b, c, d), rtol=1e-5, atol=1e-5)

    # 3) Small non-aligned input (256-element prefix + 44-element tail).
    x_sm = jnp.linspace(-1.0, 1.0, 300, dtype=jnp.float32)
    y_sm = jax.block_until_ready(poly(x_sm, a, b, c, d))
    assert jnp.allclose(y_sm, _reference(x_sm, a, b, c, d), rtol=1e-5, atol=1e-5)

    # 4) Tail-only tiny input (< 128 elements, (1, n) full-extent block).
    x_ty = jnp.linspace(-0.5, 0.5, 5, dtype=jnp.float32)
    y_ty = jax.block_until_ready(poly(x_ty, a, b, c, d))
    assert jnp.allclose(y_ty, _reference(x_ty, a, b, c, d), rtol=1e-5, atol=1e-5)

    # 5) Force a multi-step grid with a partial boundary block
    #    (15 rows, tile of 8 rows -> last block masked).
    x_pb = jnp.linspace(-3.0, 3.0, 1920, dtype=jnp.float32)
    y_pb = jax.block_until_ready(poly(x_pb, a, b, c, d, max_tile_rows=8))
    assert jnp.allclose(y_pb, _reference(x_pb, a, b, c, d), rtol=1e-5, atol=1e-5)

    # 6) bf16 input: exercises the dtype-aware sublane path; compare in f32.
    x_bf = jnp.linspace(-math.pi, math.pi, 512, dtype=jnp.bfloat16)
    y_bf = jax.block_until_ready(poly(x_bf, a, b, c, d))
    ref_bf = _reference(x_bf.astype(jnp.float32), a, b, c, d).astype(jnp.bfloat16)
    assert y_bf.dtype == jnp.bfloat16
    assert jnp.allclose(y_bf.astype(jnp.float32), ref_bf.astype(jnp.float32),
                        rtol=2e-2, atol=2e-2)

    print("KERNEL_OK")
</pallas_src>

<mosaic_0001>
module attributes {stable_mosaic.version = 11 : i64} {
  func.func @_poly3_kernel(%arg0: i32, %arg1: memref<4xf32, #tpu.memory_space<smem>>, %arg2: memref<15x128xf32, #tpu.memory_space<vmem>>, %arg3: memref<15x128xf32, #tpu.memory_space<vmem>>) attributes {dimension_semantics = [#tpu.dimension_semantics<parallel>], iteration_bounds = array<i64: 1>, scalar_prefetch = 0 : i64, scratch_operands = 0 : i64, tpu.core_type = #tpu.core_type<tc>, window_params = [{transform_indices = @transform_0, window_bounds = array<i64: 4>}, {transform_indices = @transform_1, window_bounds = array<i64: 15, 128>}, {transform_indices = @transform_2, window_bounds = array<i64: 15, 128>}]} {
    %c0 = arith.constant 0 : index
    %0 = memref.load %arg1[%c0] : memref<4xf32, #tpu.memory_space<smem>>
    %c1 = arith.constant 1 : index
    %1 = memref.load %arg1[%c1] : memref<4xf32, #tpu.memory_space<smem>>
    %c2 = arith.constant 2 : index
    %2 = memref.load %arg1[%c2] : memref<4xf32, #tpu.memory_space<smem>>
    %c3 = arith.constant 3 : index
    %3 = memref.load %arg1[%c3] : memref<4xf32, #tpu.memory_space<smem>>
    %c0_0 = arith.constant 0 : index
    %c0_1 = arith.constant 0 : index
    %4 = vector.load %arg2[%c0_0, %c0_1] : memref<15x128xf32, #tpu.memory_space<vmem>>, vector<15x128xf32>
    %5 = vector.broadcast %3 : f32 to vector<15x128xf32>
    %6 = arith.mulf %5, %4 : vector<15x128xf32>
    %7 = vector.broadcast %2 : f32 to vector<15x128xf32>
    %8 = arith.addf %6, %7 : vector<15x128xf32>
    %9 = arith.mulf %8, %4 : vector<15x128xf32>
    %10 = vector.broadcast %1 : f32 to vector<15x128xf32>
    %11 = arith.addf %9, %10 : vector<15x128xf32>
    %12 = arith.mulf %11, %4 : vector<15x128xf32>
    %13 = vector.broadcast %0 : f32 to vector<15x128xf32>
    %14 = arith.addf %12, %13 : vector<15x128xf32>
    %c0_2 = arith.constant 0 : index
    %c0_3 = arith.constant 0 : index
    %15 = vector.load %arg3[%c0_2, %c0_3] : memref<15x128xf32, #tpu.memory_space<vmem>>, vector<15x128xf32>
    tpu.vector_store %arg3[%c0_2, %c0_3], %14 {strides = array<i32>} : memref<15x128xf32, #tpu.memory_space<vmem>>, vector<15x128xf32>,
    return
  }
  func.func @transform_0(%arg0: i32) -> i32 {
    %c0_i32 = arith.constant 0 : i32
    %c0_i32_0 = arith.constant 0 : i32
    return %c0_i32 : i32
  }
  func.func @transform_1(%arg0: i32) -> (i32, i32) {
    %c0_i32 = arith.constant 0 : i32
    %c0_i32_0 = arith.constant 0 : i32
    return %arg0, %c0_i32 : i32, i32
  }
  func.func @transform_2(%arg0: i32) -> (i32, i32) {
    %c0_i32 = arith.constant 0 : i32
    %c0_i32_0 = arith.constant 0 : i32
    return %arg0, %c0_i32 : i32, i32
  }
}

</mosaic_0001>

<bundles_post_ra>
// kernel: polynomial3_forward.1
= control target key start
LH: loop header
LB: loop body
LE: loop exit
PB: predicated region body
PF: predicated region fallthrough
CT: control target
= control target key end

     0   :  { %7 = vsyncpa [#allocation3], 0  ;;  %s102_s0 = inlined_call_operand.vmem [shape: f32[4], index: 0, kind: input, shape index: {}]   ;;  %s103_s1 = inlined_call_operand.vmem [shape: f32[15,128], index: 1, kind: input, shape index: {}]   ;;  %s104_s2 = inlined_call_operand.vmem [shape: f32[15,128], index: 2, kind: output, shape index: {}]  }
   0x1   :  { %s14_s11 = sshll.u32 %s102_s0, 4  ;;  %s15_s11 = int_to_ptr.vmem [resolvable:$true] %s14_s11 }
   0x2   :  { %s57_s12 = scalar_lea.vmem %s15_s11, 16  ;;  %p62_p1 = scmp.lt.s32.totalorder %s15_s11, %s15_s11 }
   0x3   :  { %p58_p0 = scmp.ne.s32.totalorder %s15_s11, %s57_s12  ;;  %p63_p2 = scmp.lt.s32.totalorder %s57_s12, %s57_s12 }
   0x5   :  { %p64_p3 = por %p63_p2, %p62_p1 }
   0x7   :  { %p65_p4 = pnand %p64_p3, %p58_p0 }
   0x9   :  { %68 = shalt.err (!%p65_p4)
}
   0xa   :  { %s71_s13 = smov [#allocation2]  }
   0xb   :  { %17 = dma.vmem_to_smem %s15_s11, 16, %s71_s13, [#allocation3]  }
   0xc   :  { %69 = dma.done.wait [#allocation3], 16  }
   0xd   :  { %70 = vsyncadd [#allocation3], 4294967280 }
   0xe   :  { %23 = sfence }
   0xf   :  { %s54_s14 = sld [smem:[#allocation2 + $0x2]]  ;;  %s55_s15 = sld [smem:[#allocation2 + $0x3]]  ;;  %v28_v0 = vld [vmem:[%s103_s1] sm:$0xff]  ;;  %v29_v1 = vld [vmem:[%s103_s1 + $0x8] sm:$0x7f] }
  0x10   :  { %s53_s16 = sld [smem:[#allocation2 + $0x1]]  ;;  %s24_s20 = sld [smem:[#allocation2]] }
  0x15   :  { %v30_v2 = vstv %s55_s15  ;;  %v33_v3 = vstv %s54_s14 }
  0x16   :  { %v31_v4 = vmul.f32 %v30_v2, %v28_v0  ;;  %v32_v5 = vmul.f32 %v30_v2, %v29_v1  ;;  %v38_v8 = vstv %s53_s16  ;;  %v43_v13 = vstv %s24_s20 }
  0x18   :  { %v34_v6 = vadd.f32 %v33_v3, %v31_v4  ;;  %v35_v7 = vadd.f32 %v33_v3, %v32_v5 }
  0x1a   :  { %v36_v9 = vmul.f32 %v34_v6, %v28_v0  ;;  %v37_v10 = vmul.f32 %v35_v7, %v29_v1 }
  0x1c   :  { %v39_v11 = vadd.f32 %v38_v8, %v36_v9  ;;  %v40_v12 = vadd.f32 %v38_v8, %v37_v10 }
  0x1e   :  { %v41_v14 = vmul.f32 %v39_v11, %v28_v0  ;;  %v42_v15 = vmul.f32 %v40_v12, %v29_v1 }
  0x20   :  { %v44_v16 = vadd.f32 %v43_v13, %v41_v14  ;;  %v45_v17 = vadd.f32 %v43_v13, %v42_v15 }
  0x22   :  { %46 = vst [vmem:[%s104_s2] sm:$0xff] %v44_v16  ;;  %47 = vst [vmem:[%s104_s2 + $0x8] sm:$0x7f] %v45_v17 }
  0x23   :  { %52 = vsyncpa [#allocation3], 1 }

</bundles_post_ra>
